<compile_context>
chip_gen: v6e
topology: v6e:2x2x1
jax: 0.10.0
libtpu: 0.0.40
codegen_flags: <defaults>
</compile_context>

<pallas_src>
import functools

import jax
import jax.numpy as jnp
from jax.experimental import pallas as pl
from jax.experimental.pallas import tpu as pltpu


def _layernorm_kernel(x_ref, alpha_ref, beta_ref, o_ref, *, eps):
    # x_ref: (tile_rows, F); alpha_ref/beta_ref: (1, F)
    x = x_ref[...].astype(jnp.float32)
    n = x.shape[-1]

    # One-pass statistics: one pair of cross-lane reductions instead of two
    # dependent ones (halves XLU traffic; v6e/v7x only have 2 XLUs).
    sum_x = jnp.sum(x, axis=-1, keepdims=True)
    sum_x2 = jnp.sum(x * x, axis=-1, keepdims=True)
    mean = sum_x * (1.0 / n)
    # Unbiased variance (Bessel's correction) to match torch.std() default.
    var = (sum_x2 - sum_x * mean) * (1.0 / max(n - 1, 1))
    var = jnp.maximum(var, 0.0)  # guard tiny negatives from cancellation
    std = jnp.sqrt(var)

    # Divide -> EUP reciprocal + VPU multiply; keeps VALU free so the kernel
    # stays purely HBM/DMA bound.
    inv = pl.reciprocal(std + eps, approx=True)

    alpha = alpha_ref[...].astype(jnp.float32)
    beta = beta_ref[...].astype(jnp.float32)
    y = (x - mean) * inv * alpha + beta
    o_ref[...] = y.astype(o_ref.dtype)


def _pick_tiling(rows, features, itemsize):
    """VMEM-aware row-tile selection.

    Input + output blocks, each double-buffered -> ~4 block copies resident.
    Budget at most half of physical VMEM for that buffering; cap at 1024 rows.
    """
    row_align = 16 if itemsize < 4 else 8  # bf16 packs 2 rows per sublane
    try:
        vmem_cap = int(pltpu.get_tpu_info().vmem_capacity_bytes)
    except Exception:
        vmem_cap = 64 * 1024 * 1024  # conservative fallback (v7x per-TC)

    budget = vmem_cap // 2  # bytes allowed for all pipeline buffers
    max_rows_by_vmem = budget // (4 * features * itemsize)
    tile = min(1024, max(row_align, max_rows_by_vmem))
    tile = max(row_align, (tile // row_align) * row_align)

    padded_rows = ((rows + row_align - 1) // row_align) * row_align
    if tile >= padded_rows:
        tile = padded_rows  # single block already covers everything
    padded_rows = ((padded_rows + tile - 1) // tile) * tile

    block_bytes = tile * features * itemsize
    needed = 4 * block_bytes + 4 * features * 4 + (2 << 20)  # blocks + params + margin
    vmem_limit = int(min(vmem_cap, max(needed, 32 * 1024 * 1024)))
    return tile, padded_rows, vmem_limit


def layer_normalization(x, alpha, beta, eps=1e-6):
    """x: (..., F). alpha, beta: (F,). Matches the PyTorch LayerNormalization."""
    orig_shape = x.shape
    features = orig_shape[-1]
    rows = 1
    for d in orig_shape[:-1]:
        rows *= d

    x2 = x.reshape(rows, features)
    alpha2 = alpha.reshape(1, features)
    beta2 = beta.reshape(1, features)

    itemsize = jnp.dtype(x.dtype).itemsize
    tile, padded_rows, vmem_limit = _pick_tiling(rows, features, itemsize)

    if padded_rows != rows:
        # Pad rows instead of collapsing to one huge block; padded rows compute
        # harmless finite values and are sliced off below.
        x2 = jnp.pad(x2, ((0, padded_rows - rows), (0, 0)))

    grid = (padded_rows // tile,)

    # NOTE: for best store efficiency `features` should be a multiple of 128
    # (lane-dense output); smaller F is still correct but uses masked stores.
    out = pl.pallas_call(
        functools.partial(_layernorm_kernel, eps=eps),
        out_shape=jax.ShapeDtypeStruct((padded_rows, features), x.dtype),
        grid_spec=pl.GridSpec(
            grid=grid,
            in_specs=[
                pl.BlockSpec((tile, features), lambda i: (i, 0)),
                pl.BlockSpec((1, features), lambda i: (0, 0)),
                pl.BlockSpec((1, features), lambda i: (0, 0)),
            ],
            out_specs=pl.BlockSpec((tile, features), lambda i: (i, 0)),
        ),
        compiler_params=pltpu.CompilerParams(
            dimension_semantics=("parallel",),
            vmem_limit_bytes=vmem_limit,
        ),
    )(x2, alpha2, beta2)

    if padded_rows != rows:
        out = out[:rows]
    return out.reshape(orig_shape)


def decoder_forward(x, encoder_output, src_mask, tgt_mask, layers, alpha, beta, eps=1e-6):
    """Mirrors Decoder.forward: apply the provided layers, then the final norm."""
    # TODO(synk): the decoder sub-layers come from an externally supplied
    # nn.ModuleList with no definition in the spec; they are treated as opaque
    # JAX callables here and only the final LayerNormalization is a Pallas kernel.
    for layer in layers:
        x = layer(x, encoder_output, src_mask, tgt_mask)
    return layer_normalization(x, alpha, beta, eps)


if __name__ == "__main__":
    key = jax.random.PRNGKey(0)
    batch, seq, hidden = 2, 8, 128  # hidden multiple of 128 -> lane-dense stores
    kx, ke = jax.random.split(key)
    x = jax.random.normal(kx, (batch, seq, hidden), dtype=jnp.float32)
    encoder_output = jax.random.normal(ke, (batch, seq, hidden), dtype=jnp.float32)
    src_mask = jnp.ones((batch, 1, 1, seq), dtype=jnp.float32)
    tgt_mask = jnp.ones((batch, 1, seq, seq), dtype=jnp.float32)

    # deterministic parameter init matching nn.Parameter(torch.ones/zeros(features))
    alpha = jnp.ones((hidden,), dtype=jnp.float32)
    beta = jnp.zeros((hidden,), dtype=jnp.float32)

    out = decoder_forward(x, encoder_output, src_mask, tgt_mask, (), alpha, beta, eps=1e-6)
    out = jax.block_until_ready(out)

    # Reference (same semantics: unbiased std, eps added to std). Slightly
    # relaxed tolerance because the kernel uses the EUP approximate reciprocal
    # and one-pass variance.
    mean = jnp.mean(x, axis=-1, keepdims=True)
    std = jnp.sqrt(jnp.sum((x - mean) ** 2, axis=-1, keepdims=True) / (hidden - 1))
    ref = alpha * (x - mean) / (std + 1e-6) + beta
    assert jnp.allclose(out, ref, atol=5e-3, rtol=5e-3), float(jnp.max(jnp.abs(out - ref)))

    print("KERNEL_OK")
</pallas_src>

<mosaic_0001>
module attributes {stable_mosaic.version = 11 : i64} {
  func.func @_layernorm_kernel(%arg0: i32, %arg1: memref<16x128xf32, #tpu.memory_space<vmem>>, %arg2: memref<1x128xf32, #tpu.memory_space<vmem>>, %arg3: memref<1x128xf32, #tpu.memory_space<vmem>>, %arg4: memref<16x128xf32, #tpu.memory_space<vmem>>) attributes {dimension_semantics = [#tpu.dimension_semantics<parallel>], iteration_bounds = array<i64: 1>, scalar_prefetch = 0 : i64, scratch_operands = 0 : i64, tpu.core_type = #tpu.core_type<tc>, window_params = [{transform_indices = @transform_0, window_bounds = array<i64: 16, 128>}, {pipeline_mode = #tpu.pipeline_mode<synchronous>, transform_indices = @transform_1, window_bounds = array<i64: 1, 128>}, {pipeline_mode = #tpu.pipeline_mode<synchronous>, transform_indices = @transform_2, window_bounds = array<i64: 1, 128>}, {transform_indices = @transform_3, window_bounds = array<i64: 16, 128>}]} {
    %c0 = arith.constant 0 : index
    %c0_0 = arith.constant 0 : index
    %0 = vector.load %arg1[%c0, %c0_0] : memref<16x128xf32, #tpu.memory_space<vmem>>, vector<16x128xf32>
    %cst = arith.constant dense<0.000000e+00> : vector<16xf32>
    %1 = vector.multi_reduction <add>, %0, %cst [1] : vector<16x128xf32> to vector<16xf32>
    %2 = vector.shape_cast %1 : vector<16xf32> to vector<16x1xf32>
    %3 = arith.mulf %0, %0 : vector<16x128xf32>
    %cst_1 = arith.constant dense<0.000000e+00> : vector<16xf32>
    %4 = vector.multi_reduction <add>, %3, %cst_1 [1] : vector<16x128xf32> to vector<16xf32>
    %5 = vector.shape_cast %4 : vector<16xf32> to vector<16x1xf32>
    %cst_2 = arith.constant 7.812500e-03 : f32
    %6 = vector.broadcast %cst_2 : f32 to vector<16x1xf32>
    %7 = arith.mulf %2, %6 : vector<16x1xf32>
    %8 = arith.mulf %2, %7 : vector<16x1xf32>
    %9 = arith.subf %5, %8 : vector<16x1xf32>
    %cst_3 = arith.constant 0.00787401571 : f32
    %10 = vector.broadcast %cst_3 : f32 to vector<16x1xf32>
    %11 = arith.mulf %9, %10 : vector<16x1xf32>
    %cst_4 = arith.constant 0.000000e+00 : f32
    %12 = vector.broadcast %cst_4 : f32 to vector<16x1xf32>
    %13 = arith.maximumf %11, %12 : vector<16x1xf32>
    %14 = math.sqrt %13 : vector<16x1xf32>
    %cst_5 = arith.constant 9.99999997E-7 : f32
    %15 = vector.broadcast %cst_5 : f32 to vector<16x1xf32>
    %16 = arith.addf %14, %15 : vector<16x1xf32>
    %17 = tpu.reciprocal %16 {approx = true} : vector<16x1xf32> -> vector<16x1xf32>
    %c0_6 = arith.constant 0 : index
    %c0_7 = arith.constant 0 : index
    %18 = vector.load %arg2[%c0_6, %c0_7] : memref<1x128xf32, #tpu.memory_space<vmem>>, vector<1x128xf32>
    %c0_8 = arith.constant 0 : index
    %c0_9 = arith.constant 0 : index
    %19 = vector.load %arg3[%c0_8, %c0_9] : memref<1x128xf32, #tpu.memory_space<vmem>>, vector<1x128xf32>
    %20 = vector.broadcast %7 : vector<16x1xf32> to vector<16x128xf32>
    %21 = arith.subf %0, %20 : vector<16x128xf32>
    %22 = vector.broadcast %17 : vector<16x1xf32> to vector<16x128xf32>
    %23 = arith.mulf %21, %22 : vector<16x128xf32>
    %24 = vector.broadcast %18 : vector<1x128xf32> to vector<16x128xf32>
    %25 = arith.mulf %23, %24 : vector<16x128xf32>
    %26 = vector.broadcast %19 : vector<1x128xf32> to vector<16x128xf32>
    %27 = arith.addf %25, %26 : vector<16x128xf32>
    %c0_10 = arith.constant 0 : index
    %c0_11 = arith.constant 0 : index
    %28 = vector.load %arg4[%c0_10, %c0_11] : memref<16x128xf32, #tpu.memory_space<vmem>>, vector<16x128xf32>
    tpu.vector_store %arg4[%c0_10, %c0_11], %27 {strides = array<i32>} : memref<16x128xf32, #tpu.memory_space<vmem>>, vector<16x128xf32>,
    return
  }
  func.func @transform_0(%arg0: i32) -> (i32, i32) {
    %c0_i32 = arith.constant 0 : i32
    %c0_i32_0 = arith.constant 0 : i32
    return %arg0, %c0_i32 : i32, i32
  }
  func.func @transform_1(%arg0: i32) -> (i32, i32) {
    %c0_i32 = arith.constant 0 : i32
    %c0_i32_0 = arith.constant 0 : i32
    %c0_i32_1 = arith.constant 0 : i32
    return %c0_i32, %c0_i32_0 : i32, i32
  }
  func.func @transform_2(%arg0: i32) -> (i32, i32) {
    %c0_i32 = arith.constant 0 : i32
    %c0_i32_0 = arith.constant 0 : i32
    %c0_i32_1 = arith.constant 0 : i32
    return %c0_i32, %c0_i32_0 : i32, i32
  }
  func.func @transform_3(%arg0: i32) -> (i32, i32) {
    %c0_i32 = arith.constant 0 : i32
    %c0_i32_0 = arith.constant 0 : i32
    return %arg0, %c0_i32 : i32, i32
  }
}

</mosaic_0001>

<bundles_post_ra>
// kernel: tpu_custom_call.1
= control target key start
LH: loop header
LB: loop body
LE: loop exit
PB: predicated region body
PF: predicated region fallthrough
CT: control target
= control target key end

     0   :  { %8 = vsyncpa [#allocation3], 0  ;;  %s210_s0 = inlined_call_operand.hbm [shape: f32[16,128], index: 0, kind: input, shape index: {}]   ;;  %s211_s1 = inlined_call_operand.vmem [shape: f32[1,128], index: 1, kind: input, shape index: {}]   ;;  %s212_s2 = inlined_call_operand.vmem [shape: f32[1,128], index: 2, kind: input, shape index: {}]   ;;  %s213_s3 = inlined_call_operand.hbm [shape: f32[16,128], index: 3, kind: output, shape index: {}]  }
   0x1   :  { %9 = vsyncpa [#allocation4], 0  ;;  %s168_s12 = smov [#allocation2]  }
   0x2   :  { %s15_s13 = sshll.u32 %s168_s12, 4  ;;  %s16_s13 = int_to_ptr.vmem [resolvable:$true] %s15_s13 }
   0x3   :  { %s132_s14 = scalar_lea.vmem %s16_s13, 256  ;;  %p137_p1 = scmp.lt.s32.totalorder %s16_s13, %s16_s13 }
   0x4   :  { %p133_p0 = scmp.ne.s32.totalorder %s16_s13, %s132_s14  ;;  %p138_p2 = scmp.lt.s32.totalorder %s132_s14, %s132_s14 }
   0x6   :  { %p139_p3 = por %p138_p2, %p137_p1 }
   0x8   :  { %p140_p4 = pnand %p139_p3, %p133_p0 }
   0xa   :  { %143 = shalt.err (!%p140_p4)
}
   0xb   :  { %s169_s15 = smov 128   ;;  %s170_s16 = smov 8  }
   0xc   :  { %21 = dma.hbm_to_vmem [thread:$0]  %s210_s0, 256, %s16_s13, [#allocation3], %s169_s15, %s169_s15, %s170_s16  }
   0xd   :  { %164 = dma.done.wait [#allocation3], 256  }
   0xe   :  { %165 = vsyncadd [#allocation3], 4294967040  ;;  %v29_v0 = vld [vmem:[#allocation2] sm:$0xff]  ;;  %v30_v2 = vld [vmem:[#allocation2 + $0x8] sm:$0xff]  ;;  %s171_s22 = smov [#allocation5]  }
   0xf   :  { %31 = vadd.xlane.f32.xlu0 %v29_v0  ;;  %v35_v1 = vmul.f32 %v29_v0, %v29_v0  ;;  %v36_v3 = vmul.f32 %v30_v2, %v30_v2  ;;  %v110_v32 = vld [vmem:[%s211_s1] ss:$0 sm:$0xff]  ;;  %s98_s23 = sshll.u32 %s171_s22, 4  ;;  %s99_s23 = int_to_ptr.vmem [resolvable:$true] %s98_s23 }
  0x10   :  { %v111_v34 = vld [vmem:[%s212_s2] ss:$0 sm:$0xff]  ;;  %s144_s24 = scalar_lea.vmem %s99_s23, 256  ;;  %p149_p6 = scmp.lt.s32.totalorder %s99_s23, %s99_s23 }
  0x11   :  { %37 = vadd.xlane.f32.xlu1 %v35_v1  ;;  %p145_p5 = scmp.ne.s32.totalorder %s99_s23, %s144_s24  ;;  %p150_p7 = scmp.lt.s32.totalorder %s144_s24, %s144_s24 }
  0x13   :  { %33 = vadd.xlane.f32.xlu0 %v30_v2  ;;  %p151_p8 = por %p150_p7, %p149_p6 }
  0x15   :  { %39 = vadd.xlane.f32.xlu1 %v36_v3  ;;  %p152_p9 = pnand %p151_p8, %p145_p5 }
  0x98   :  { %v32_v4 = vpop.xlane.xlu0 %31 }
  0x99   :  { %v41_v5 = vmul.f32 0.0078125, %v32_v4 }
  0x9a   :  { %v38_v6 = vpop.xlane.xlu1 %37 }
  0x9b   :  { %v43_v7 = vmul.f32 %v41_v5, %v32_v4  ;;  %v71_v30 = vsub.f32 %v29_v0, %v41_v5 }
  0x9c   :  { %v34_v8 = vpop.xlane.xlu0 %33 }
  0x9d   :  { %v42_v9 = vmul.f32 0.0078125, %v34_v8  ;;  %v45_v10 = vsub.f32 %v38_v6, %v43_v7 }
  0x9e   :  { %v40_v11 = vpop.xlane.xlu1 %39 }
  0x9f   :  { %v44_v12 = vmul.f32 %v42_v9, %v34_v8  ;;  %v47_v13 = vmul.f32 0.007874016, %v45_v10  ;;  %v72_v36 = vsub.f32 %v30_v2, %v42_v9 }
  0xa1   :  { %v49_v14 = vmax.f32 %v47_v13, 0.0  ;;  %v46_v15 = vsub.f32 %v40_v11, %v44_v12 }
  0xa3   :  { %116 = vrsqrt.f32 %v49_v14  ;;  %v48_v16 = vmul.f32 0.007874016, %v46_v15  ;;  %vm53_vm0 = vcmp.eq.f32.partialorder %v49_v14, inf  ;;  %v56_v20 = vand.u32 2147483648, %v49_v14 }
  0xa4   :  { %vm55_vm1 = vcmp.eq.f32.partialorder %v49_v14, 0.0 }
  0xa5   :  { %v50_v17 = vmax.f32 %v48_v16, 0.0 }
  0xa7   :  { %118 = vrsqrt.f32 %v50_v17  ;;  %vm60_vm2 = vcmp.eq.f32.partialorder %v50_v17, inf  ;;  %v63_v26 = vand.u32 2147483648, %v50_v17  ;;  %vm62_vm3 = vcmp.eq.f32.partialorder %v50_v17, 0.0 }
  0xb0   :  { %v117_v18 = vpop.eup %116 }
  0xb1   :  { %v52_v19 = vmul.f32 %v117_v18, %v49_v14 }
  0xb3   :  { %v54_v21 = vsel %vm53_vm0, %v49_v14, %v52_v19 }
  0xb4   :  { %v57_v22 = vsel %vm55_vm1, %v56_v20, %v54_v21  ;;  %v119_v23 = vpop.eup %118 }
  0xb5   :  { %v65_v24 = vadd.f32 1e-06, %v57_v22  ;;  %v59_v25 = vmul.f32 %v119_v23, %v50_v17 }
  0xb7   :  { %120 = vrcp.f32 %v65_v24  ;;  %v61_v27 = vsel %vm60_vm2, %v50_v17, %v59_v25 }
  0xb8   :  { %v64_v28 = vsel %vm62_vm3, %v63_v26, %v61_v27 }
  0xb9   :  { %v66_v29 = vadd.f32 1e-06, %v64_v28 }
  0xbb   :  { %122 = vrcp.f32 %v66_v29 }
  0xc4   :  { %v121_v31 = vpop.eup %120 }
  0xc5   :  { %v73_v33 = vmul.f32 %v121_v31, %v71_v30 }
  0xc7   :  { %v81_v35 = vmul.f32 %v110_v32, %v73_v33 }
  0xc8   :  { %v123_v37 = vpop.eup %122 }
  0xc9   :  { %v89_v38 = vadd.f32 %v111_v34, %v81_v35  ;;  %v74_v39 = vmul.f32 %v123_v37, %v72_v36 }
  0xcb   :  { %91 = vst [vmem:[#allocation5] sm:$0xff] %v89_v38  ;;  %v82_v40 = vmul.f32 %v110_v32, %v74_v39 }
  0xcd   :  { %v90_v41 = vadd.f32 %v111_v34, %v82_v40 }
  0xcf   :  { %92 = vst [vmem:[#allocation5 + $0x8] sm:$0xff] %v90_v41 }
  0xd0   :  { %155 = shalt.err (!%p152_p9)
}
  0xd1   :  { %104 = dma.vmem_to_hbm [thread:$0]  %s99_s23, 256, %s213_s3, [#allocation4], %s169_s15, %s169_s15, %s170_s16  }
  0xd2   :  { %166 = dma.done.wait [#allocation4], 256  }
  0xd3   :  { %167 = vsyncadd [#allocation4], 4294967040 }
  0xd4   :  { %108 = vsyncpa [#allocation3], 1 }
  0xd5   :  { %109 = vsyncpa [#allocation4], 1 }

</bundles_post_ra>
